<compile_context>
chip_gen: v7x
topology: tpu7x:2x2x1
jax: 0.10.0
libtpu: 0.0.40
codegen_flags: <defaults>
</compile_context>

<pallas_src>
import jax
import jax.numpy as jnp
from jax.experimental import pallas as pl
from jax.experimental.pallas import tpu as pltpu


def _round_up(n, m):
    return ((n + m - 1) // m) * m


_PAR = pltpu.CompilerParams(dimension_semantics=("parallel",))
_TM_MAX = 2048      # conv lane-tile cap (safe for v5e 16 MiB scoped VMEM)
_TB_MAX = 256       # fc batch-tile cap


# ----------------------------------------------------------------------------
# Pallas kernels
# ----------------------------------------------------------------------------
def _conv_relu_pool_kernel(p_ref, w_ref, b_ref, o_ref):
    """Fused conv (matmul over the 4 pooling phases) + bias + ReLU + 2x2 maxpool.

    p_ref: (4, K, TM) bf16  pooled-phase im2col patches (K unpadded: C*KH*KW)
    w_ref: (OCP, K)   bf16  conv weights, OC padded to 16
    b_ref: (OCP, 1)   f32   bias (broadcast along lanes)
    o_ref: (OCP, TM)  bf16  pooled activations

    relu(max_phase(W@P_phase) + b) == maxpool2x2(relu(conv + b)) because the
    bias is per-channel constant and relu is monotone, so the pool fuses into
    the matmul epilogue (requires even conv-output H/W: true here, 28 and 10).
    """
    w = w_ref[...]
    acc = jnp.dot(w, p_ref[0], preferred_element_type=jnp.float32)
    for ph in range(1, 4):
        acc = jnp.maximum(
            acc, jnp.dot(w, p_ref[ph], preferred_element_type=jnp.float32))
    o_ref[...] = jnp.maximum(acc + b_ref[...], 0.0).astype(o_ref.dtype)


def _fc_head_kernel(x_ref, w1_ref, b1_ref, w2_ref, b2_ref, w3_ref, b3_ref, o_ref):
    """fc1->ReLU->fc2->ReLU->fc3 fused; intermediates never leave the core."""
    h = jnp.dot(x_ref[...], w1_ref[...],
                preferred_element_type=jnp.float32) + b1_ref[...]
    h = jnp.maximum(h, 0.0).astype(jnp.bfloat16)
    h = jnp.dot(h, w2_ref[...],
                preferred_element_type=jnp.float32) + b2_ref[...]
    h = jnp.maximum(h, 0.0).astype(jnp.bfloat16)
    o_ref[...] = jnp.dot(h, w3_ref[...],
                         preferred_element_type=jnp.float32) + b3_ref[...]


# ----------------------------------------------------------------------------
# Wrappers
# ----------------------------------------------------------------------------
def _pooled_phase_patches(x_cbhw, kh, kw, ho, wo, mp):
    """(C,B,H,W) -> (4, C*kh*kw, MP) bf16 im2col, one slab per 2x2 pool phase."""
    C, B, _, _ = x_cbhw.shape
    M = B * ho * wo
    phases = []
    for pi in range(2):
        for pj in range(2):
            rows = []
            for i in range(kh):
                for j in range(kw):
                    rows.append(x_cbhw[:, :,
                                       pi + i:pi + i + 2 * ho:2,
                                       pj + j:pj + j + 2 * wo:2])   # (C,B,HO,WO)
            r = jnp.stack(rows, axis=1)                # (C, kh*kw, B, HO, WO)
            phases.append(r.reshape(C * kh * kw, M))
    p = jnp.stack(phases, axis=0)                      # (4, K, M)  — K unpadded
    p = jnp.pad(p, ((0, 0), (0, 0), (0, mp - M)))      # lane dim -> multiple of TM
    return p.astype(jnp.bfloat16)


def conv_relu_pool(x_cbhw, w, b):
    """PyTorch conv2d (valid, stride 1) + ReLU + maxpool(2,2); CBHW in/out."""
    OC, C, KH, KW = w.shape
    Cx, B, H, W = x_cbhw.shape
    assert Cx == C
    K = C * KH * KW                    # contraction dim left UNPADDED (75 / 150)
    OCP = _round_up(OC, 16)            # bf16 (16,128) vreg packing
    HO, WO = (H - KH + 1) // 2, (W - KW + 1) // 2
    M = B * HO * WO                    # lane-dense output dim (big dim last)
    MP = _round_up(M, 128)
    TM = min(MP, _TM_MAX)              # lane tile, multiple of 128
    MP = _round_up(MP, TM)
    patches = _pooled_phase_patches(x_cbhw, KH, KW, HO, WO, MP)
    wmat = jnp.pad(w.reshape(OC, K).astype(jnp.float32),
                   ((0, OCP - OC), (0, 0))).astype(jnp.bfloat16)
    bcol = jnp.pad(b.astype(jnp.float32), (0, OCP - OC)).reshape(OCP, 1)

    out = pl.pallas_call(
        _conv_relu_pool_kernel,
        out_shape=jax.ShapeDtypeStruct((OCP, MP), jnp.bfloat16),
        grid=(MP // TM,),
        in_specs=[
            pl.BlockSpec((4, K, TM), lambda m: (0, 0, m)),
            pl.BlockSpec((OCP, K), lambda m: (0, 0)),     # weights stay resident
            pl.BlockSpec((OCP, 1), lambda m: (0, 0)),
        ],
        out_specs=pl.BlockSpec((OCP, TM), lambda m: (0, m)),
        compiler_params=_PAR,
    )(patches, wmat, bcol)
    return out[:OC, :M].reshape(OC, B, HO, WO)   # pooled activations, CBHW


def fc_head(x, w1, b1, w2, b2, w3, b3):
    """relu(x@w1+b1) -> relu(.@w2+b2) -> .@w3+b3, single fused kernel, B-tiled."""
    B, K1 = x.shape
    NP = 128
    K1P = _round_up(K1, 128)                              # 400 -> 512
    n1, n2, n3 = w1.shape[1], w2.shape[1], w3.shape[1]    # 120, 84, 10
    BP = _round_up(B, 8)
    TB = min(BP, _TB_MAX)
    BP = _round_up(BP, TB)

    def pad_w(wt, kin_pad, nout):
        return jnp.pad(wt.astype(jnp.float32),
                       ((0, kin_pad - wt.shape[0]), (0, NP - nout))
                       ).astype(jnp.bfloat16)

    def pad_b(bt, nout):
        return jnp.pad(bt.astype(jnp.float32), (0, NP - nout)).reshape(1, NP)

    w1p, b1p = pad_w(w1, K1P, n1), pad_b(b1, n1)          # (512,128), (1,128)
    w2p, b2p = pad_w(w2, NP, n2), pad_b(b2, n2)           # (128,128), (1,128)
    w3p, b3p = pad_w(w3, NP, n3), pad_b(b3, n3)           # (128,128), (1,128)
    xb = jnp.pad(x.astype(jnp.bfloat16), ((0, BP - B), (0, K1P - K1)))

    out = pl.pallas_call(
        _fc_head_kernel,
        out_shape=jax.ShapeDtypeStruct((BP, NP), jnp.float32),
        grid=(BP // TB,),
        in_specs=[
            pl.BlockSpec((TB, K1P), lambda i: (i, 0)),
            pl.BlockSpec((K1P, NP), lambda i: (0, 0)),
            pl.BlockSpec((1, NP), lambda i: (0, 0)),
            pl.BlockSpec((NP, NP), lambda i: (0, 0)),
            pl.BlockSpec((1, NP), lambda i: (0, 0)),
            pl.BlockSpec((NP, NP), lambda i: (0, 0)),
            pl.BlockSpec((1, NP), lambda i: (0, 0)),
        ],
        out_specs=pl.BlockSpec((TB, NP), lambda i: (i, 0)),
        compiler_params=_PAR,
    )(xb, w1p, b1p, w2p, b2p, w3p, b3p)
    return out[:B, :n3]


# ----------------------------------------------------------------------------
# Model
# ----------------------------------------------------------------------------
def init_params(key):
    """Deterministic synthetic parameters with the module's shapes."""
    ks = jax.random.split(key, 10)

    def u(k, shape, fan_in):
        bound = 1.0 / jnp.sqrt(fan_in)
        return jax.random.uniform(k, shape, jnp.float32, -bound, bound)

    return {
        "conv1_w": u(ks[0], (6, 3, 5, 5), 3 * 5 * 5),
        "conv1_b": u(ks[1], (6,), 3 * 5 * 5),
        "conv2_w": u(ks[2], (16, 6, 5, 5), 6 * 5 * 5),
        "conv2_b": u(ks[3], (16,), 6 * 5 * 5),
        # Linear weights stored as (in, out): y = x @ W + b (== x @ W.T in torch).
        "fc1_w": u(ks[4], (16 * 5 * 5, 120), 16 * 5 * 5),
        "fc1_b": u(ks[5], (120,), 16 * 5 * 5),
        "fc2_w": u(ks[6], (120, 84), 120),
        "fc2_b": u(ks[7], (84,), 120),
        "fc3_w": u(ks[8], (84, 10), 84),
        "fc3_b": u(ks[9], (10,), 84),
    }


def cnn_forward(x, params):
    # NCHW -> CBHW so the large B*H*W axis is the lane-dense matmul output dim.
    x = jnp.transpose(x.astype(jnp.float32), (1, 0, 2, 3))         # (3, B, 32, 32)
    x = conv_relu_pool(x, params["conv1_w"], params["conv1_b"])    # (6, B, 14, 14) bf16
    x = conv_relu_pool(x, params["conv2_w"], params["conv2_b"])    # (16, B, 5, 5) bf16
    B = x.shape[1]
    x = jnp.transpose(x, (1, 0, 2, 3)).reshape(B, 16 * 5 * 5)      # == .view(-1, 400)
    return fc_head(x, params["fc1_w"], params["fc1_b"],
                   params["fc2_w"], params["fc2_b"],
                   params["fc3_w"], params["fc3_b"])               # (B, 10) f32


if __name__ == "__main__":
    # LeNet on CIFAR-sized images: 32 -conv5-> 28 -pool-> 14 -conv5-> 10 -pool-> 5.
    x = jax.random.normal(jax.random.PRNGKey(0), (2, 3, 32, 32), dtype=jnp.float32)
    params = init_params(jax.random.PRNGKey(42))

    out = jax.jit(cnn_forward)(x, params)
    out = jax.block_until_ready(out)
    assert out.shape == (2, 10) and out.dtype == jnp.float32
    print("KERNEL_OK")
</pallas_src>

<mosaic_0001>
module attributes {stable_mosaic.version = 11 : i64} {
  func.func @_conv_relu_pool_kernel(%arg0: i32, %arg1: memref<4x75x512xbf16, #tpu.memory_space<vmem>>, %arg2: memref<16x75xbf16, #tpu.memory_space<vmem>>, %arg3: memref<16x1xf32, #tpu.memory_space<vmem>>, %arg4: memref<16x512xbf16, #tpu.memory_space<vmem>>) attributes {dimension_semantics = [#tpu.dimension_semantics<parallel>], iteration_bounds = array<i64: 1>, scalar_prefetch = 0 : i64, scratch_operands = 0 : i64, tpu.core_type = #tpu.core_type<tc>, window_params = [{transform_indices = @transform_0, window_bounds = array<i64: 4, 75, 512>}, {pipeline_mode = #tpu.pipeline_mode<synchronous>, transform_indices = @transform_1, window_bounds = array<i64: 16, 75>}, {pipeline_mode = #tpu.pipeline_mode<synchronous>, transform_indices = @transform_2, window_bounds = array<i64: 16, 1>}, {transform_indices = @transform_3, window_bounds = array<i64: 16, 512>}]} {
    %c0 = arith.constant 0 : index
    %c0_0 = arith.constant 0 : index
    %0 = vector.load %arg2[%c0, %c0_0] : memref<16x75xbf16, #tpu.memory_space<vmem>>, vector<16x75xbf16>
    %c0_1 = arith.constant 0 : index
    %c0_2 = arith.constant 0 : index
    %c0_3 = arith.constant 0 : index
    %1 = vector.load %arg1[%c0_1, %c0_2, %c0_3] : memref<4x75x512xbf16, #tpu.memory_space<vmem>>, vector<1x75x512xbf16>
    %2 = vector.shape_cast %1 : vector<1x75x512xbf16> to vector<75x512xbf16>
    %cst = arith.constant dense<0.000000e+00> : vector<16x512xf32>
    %3 = tpu.matmul %0, %2, %cst {dimension_numbers = #tpu.dot_dimension_numbers<[1], [0], [0], [1], [0, 0, 1, 1], [], []>} : vector<16x75xbf16>, vector<75x512xbf16>, vector<16x512xf32> -> vector<16x512xf32>
    %c1 = arith.constant 1 : index
    %c0_4 = arith.constant 0 : index
    %c0_5 = arith.constant 0 : index
    %4 = vector.load %arg1[%c1, %c0_4, %c0_5] : memref<4x75x512xbf16, #tpu.memory_space<vmem>>, vector<1x75x512xbf16>
    %5 = vector.shape_cast %4 : vector<1x75x512xbf16> to vector<75x512xbf16>
    %cst_6 = arith.constant dense<0.000000e+00> : vector<16x512xf32>
    %6 = tpu.matmul %0, %5, %cst_6 {dimension_numbers = #tpu.dot_dimension_numbers<[1], [0], [0], [1], [0, 0, 1, 1], [], []>} : vector<16x75xbf16>, vector<75x512xbf16>, vector<16x512xf32> -> vector<16x512xf32>
    %7 = arith.maximumf %3, %6 : vector<16x512xf32>
    %c2 = arith.constant 2 : index
    %c0_7 = arith.constant 0 : index
    %c0_8 = arith.constant 0 : index
    %8 = vector.load %arg1[%c2, %c0_7, %c0_8] : memref<4x75x512xbf16, #tpu.memory_space<vmem>>, vector<1x75x512xbf16>
    %9 = vector.shape_cast %8 : vector<1x75x512xbf16> to vector<75x512xbf16>
    %cst_9 = arith.constant dense<0.000000e+00> : vector<16x512xf32>
    %10 = tpu.matmul %0, %9, %cst_9 {dimension_numbers = #tpu.dot_dimension_numbers<[1], [0], [0], [1], [0, 0, 1, 1], [], []>} : vector<16x75xbf16>, vector<75x512xbf16>, vector<16x512xf32> -> vector<16x512xf32>
    %11 = arith.maximumf %7, %10 : vector<16x512xf32>
    %c3 = arith.constant 3 : index
    %c0_10 = arith.constant 0 : index
    %c0_11 = arith.constant 0 : index
    %12 = vector.load %arg1[%c3, %c0_10, %c0_11] : memref<4x75x512xbf16, #tpu.memory_space<vmem>>, vector<1x75x512xbf16>
    %13 = vector.shape_cast %12 : vector<1x75x512xbf16> to vector<75x512xbf16>
    %cst_12 = arith.constant dense<0.000000e+00> : vector<16x512xf32>
    %14 = tpu.matmul %0, %13, %cst_12 {dimension_numbers = #tpu.dot_dimension_numbers<[1], [0], [0], [1], [0, 0, 1, 1], [], []>} : vector<16x75xbf16>, vector<75x512xbf16>, vector<16x512xf32> -> vector<16x512xf32>
    %15 = arith.maximumf %11, %14 : vector<16x512xf32>
    %c0_13 = arith.constant 0 : index
    %c0_14 = arith.constant 0 : index
    %16 = vector.load %arg3[%c0_13, %c0_14] : memref<16x1xf32, #tpu.memory_space<vmem>>, vector<16x1xf32>
    %17 = vector.broadcast %16 : vector<16x1xf32> to vector<16x512xf32>
    %18 = arith.addf %15, %17 : vector<16x512xf32>
    %cst_15 = arith.constant 0.000000e+00 : f32
    %19 = vector.broadcast %cst_15 : f32 to vector<16x512xf32>
    %20 = arith.maximumf %18, %19 : vector<16x512xf32>
    %21 = arith.truncf %20 : vector<16x512xf32> to vector<16x512xbf16>
    %c0_16 = arith.constant 0 : index
    %c0_17 = arith.constant 0 : index
    %22 = vector.load %arg4[%c0_16, %c0_17] : memref<16x512xbf16, #tpu.memory_space<vmem>>, vector<16x512xbf16>
    tpu.vector_store %arg4[%c0_16, %c0_17], %21 {strides = array<i32>} : memref<16x512xbf16, #tpu.memory_space<vmem>>, vector<16x512xbf16>,
    return
  }
  func.func @transform_0(%arg0: i32) -> (i32, i32, i32) {
    %c0_i32 = arith.constant 0 : i32
    %c0_i32_0 = arith.constant 0 : i32
    %c0_i32_1 = arith.constant 0 : i32
    return %c0_i32, %c0_i32_0, %arg0 : i32, i32, i32
  }
  func.func @transform_1(%arg0: i32) -> (i32, i32) {
    %c0_i32 = arith.constant 0 : i32
    %c0_i32_0 = arith.constant 0 : i32
    %c0_i32_1 = arith.constant 0 : i32
    return %c0_i32, %c0_i32_0 : i32, i32
  }
  func.func @transform_2(%arg0: i32) -> (i32, i32) {
    %c0_i32 = arith.constant 0 : i32
    %c0_i32_0 = arith.constant 0 : i32
    %c0_i32_1 = arith.constant 0 : i32
    return %c0_i32, %c0_i32_0 : i32, i32
  }
  func.func @transform_3(%arg0: i32) -> (i32, i32) {
    %c0_i32 = arith.constant 0 : i32
    %c0_i32_0 = arith.constant 0 : i32
    return %c0_i32, %arg0 : i32, i32
  }
}

module attributes {stable_mosaic.version = 11 : i64} {
  func.func @_conv_relu_pool_kernel(%arg0: i32, %arg1: memref<4x150x128xbf16, #tpu.memory_space<vmem>>, %arg2: memref<16x150xbf16, #tpu.memory_space<vmem>>, %arg3: memref<16x1xf32, #tpu.memory_space<vmem>>, %arg4: memref<16x128xbf16, #tpu.memory_space<vmem>>) attributes {dimension_semantics = [#tpu.dimension_semantics<parallel>], iteration_bounds = array<i64: 1>, scalar_prefetch = 0 : i64, scratch_operands = 0 : i64, tpu.core_type = #tpu.core_type<tc>, window_params = [{transform_indices = @transform_0, window_bounds = array<i64: 4, 150, 128>}, {pipeline_mode = #tpu.pipeline_mode<synchronous>, transform_indices = @transform_1, window_bounds = array<i64: 16, 150>}, {pipeline_mode = #tpu.pipeline_mode<synchronous>, transform_indices = @transform_2, window_bounds = array<i64: 16, 1>}, {transform_indices = @transform_3, window_bounds = array<i64: 16, 128>}]} {
    %c0 = arith.constant 0 : index
    %c0_0 = arith.constant 0 : index
    %0 = vector.load %arg2[%c0, %c0_0] : memref<16x150xbf16, #tpu.memory_space<vmem>>, vector<16x150xbf16>
    %c0_1 = arith.constant 0 : index
    %c0_2 = arith.constant 0 : index
    %c0_3 = arith.constant 0 : index
    %1 = vector.load %arg1[%c0_1, %c0_2, %c0_3] : memref<4x150x128xbf16, #tpu.memory_space<vmem>>, vector<1x150x128xbf16>
    %2 = vector.shape_cast %1 : vector<1x150x128xbf16> to vector<150x128xbf16>
    %cst = arith.constant dense<0.000000e+00> : vector<16x128xf32>
    %3 = tpu.matmul %0, %2, %cst {dimension_numbers = #tpu.dot_dimension_numbers<[1], [0], [0], [1], [0, 0, 1, 1], [], []>} : vector<16x150xbf16>, vector<150x128xbf16>, vector<16x128xf32> -> vector<16x128xf32>
    %c1 = arith.constant 1 : index
    %c0_4 = arith.constant 0 : index
    %c0_5 = arith.constant 0 : index
    %4 = vector.load %arg1[%c1, %c0_4, %c0_5] : memref<4x150x128xbf16, #tpu.memory_space<vmem>>, vector<1x150x128xbf16>
    %5 = vector.shape_cast %4 : vector<1x150x128xbf16> to vector<150x128xbf16>
    %cst_6 = arith.constant dense<0.000000e+00> : vector<16x128xf32>
    %6 = tpu.matmul %0, %5, %cst_6 {dimension_numbers = #tpu.dot_dimension_numbers<[1], [0], [0], [1], [0, 0, 1, 1], [], []>} : vector<16x150xbf16>, vector<150x128xbf16>, vector<16x128xf32> -> vector<16x128xf32>
    %7 = arith.maximumf %3, %6 : vector<16x128xf32>
    %c2 = arith.constant 2 : index
    %c0_7 = arith.constant 0 : index
    %c0_8 = arith.constant 0 : index
    %8 = vector.load %arg1[%c2, %c0_7, %c0_8] : memref<4x150x128xbf16, #tpu.memory_space<vmem>>, vector<1x150x128xbf16>
    %9 = vector.shape_cast %8 : vector<1x150x128xbf16> to vector<150x128xbf16>
    %cst_9 = arith.constant dense<0.000000e+00> : vector<16x128xf32>
    %10 = tpu.matmul %0, %9, %cst_9 {dimension_numbers = #tpu.dot_dimension_numbers<[1], [0], [0], [1], [0, 0, 1, 1], [], []>} : vector<16x150xbf16>, vector<150x128xbf16>, vector<16x128xf32> -> vector<16x128xf32>
    %11 = arith.maximumf %7, %10 : vector<16x128xf32>
    %c3 = arith.constant 3 : index
    %c0_10 = arith.constant 0 : index
    %c0_11 = arith.constant 0 : index
    %12 = vector.load %arg1[%c3, %c0_10, %c0_11] : memref<4x150x128xbf16, #tpu.memory_space<vmem>>, vector<1x150x128xbf16>
    %13 = vector.shape_cast %12 : vector<1x150x128xbf16> to vector<150x128xbf16>
    %cst_12 = arith.constant dense<0.000000e+00> : vector<16x128xf32>
    %14 = tpu.matmul %0, %13, %cst_12 {dimension_numbers = #tpu.dot_dimension_numbers<[1], [0], [0], [1], [0, 0, 1, 1], [], []>} : vector<16x150xbf16>, vector<150x128xbf16>, vector<16x128xf32> -> vector<16x128xf32>
    %15 = arith.maximumf %11, %14 : vector<16x128xf32>
    %c0_13 = arith.constant 0 : index
    %c0_14 = arith.constant 0 : index
    %16 = vector.load %arg3[%c0_13, %c0_14] : memref<16x1xf32, #tpu.memory_space<vmem>>, vector<16x1xf32>
    %17 = vector.broadcast %16 : vector<16x1xf32> to vector<16x128xf32>
    %18 = arith.addf %15, %17 : vector<16x128xf32>
    %cst_15 = arith.constant 0.000000e+00 : f32
    %19 = vector.broadcast %cst_15 : f32 to vector<16x128xf32>
    %20 = arith.maximumf %18, %19 : vector<16x128xf32>
    %21 = arith.truncf %20 : vector<16x128xf32> to vector<16x128xbf16>
    %c0_16 = arith.constant 0 : index
    %c0_17 = arith.constant 0 : index
    %22 = vector.load %arg4[%c0_16, %c0_17] : memref<16x128xbf16, #tpu.memory_space<vmem>>, vector<16x128xbf16>
    tpu.vector_store %arg4[%c0_16, %c0_17], %21 {strides = array<i32>} : memref<16x128xbf16, #tpu.memory_space<vmem>>, vector<16x128xbf16>,
    return
  }
  func.func @transform_0(%arg0: i32) -> (i32, i32, i32) {
    %c0_i32 = arith.constant 0 : i32
    %c0_i32_0 = arith.constant 0 : i32
    %c0_i32_1 = arith.constant 0 : i32
    return %c0_i32, %c0_i32_0, %arg0 : i32, i32, i32
  }
  func.func @transform_1(%arg0: i32) -> (i32, i32) {
    %c0_i32 = arith.constant 0 : i32
    %c0_i32_0 = arith.constant 0 : i32
    %c0_i32_1 = arith.constant 0 : i32
    return %c0_i32, %c0_i32_0 : i32, i32
  }
  func.func @transform_2(%arg0: i32) -> (i32, i32) {
    %c0_i32 = arith.constant 0 : i32
    %c0_i32_0 = arith.constant 0 : i32
    %c0_i32_1 = arith.constant 0 : i32
    return %c0_i32, %c0_i32_0 : i32, i32
  }
  func.func @transform_3(%arg0: i32) -> (i32, i32) {
    %c0_i32 = arith.constant 0 : i32
    %c0_i32_0 = arith.constant 0 : i32
    return %c0_i32, %arg0 : i32, i32
  }
}

module attributes {stable_mosaic.version = 11 : i64} {
  func.func @_fc_head_kernel(%arg0: i32, %arg1: memref<8x512xbf16, #tpu.memory_space<vmem>>, %arg2: memref<512x128xbf16, #tpu.memory_space<vmem>>, %arg3: memref<1x128xf32, #tpu.memory_space<vmem>>, %arg4: memref<128x128xbf16, #tpu.memory_space<vmem>>, %arg5: memref<1x128xf32, #tpu.memory_space<vmem>>, %arg6: memref<128x128xbf16, #tpu.memory_space<vmem>>, %arg7: memref<1x128xf32, #tpu.memory_space<vmem>>, %arg8: memref<8x128xf32, #tpu.memory_space<vmem>>) attributes {dimension_semantics = [#tpu.dimension_semantics<parallel>], iteration_bounds = array<i64: 1>, scalar_prefetch = 0 : i64, scratch_operands = 0 : i64, tpu.core_type = #tpu.core_type<tc>, window_params = [{transform_indices = @transform_0, window_bounds = array<i64: 8, 512>}, {pipeline_mode = #tpu.pipeline_mode<synchronous>, transform_indices = @transform_1, window_bounds = array<i64: 512, 128>}, {pipeline_mode = #tpu.pipeline_mode<synchronous>, transform_indices = @transform_2, window_bounds = array<i64: 1, 128>}, {pipeline_mode = #tpu.pipeline_mode<synchronous>, transform_indices = @transform_3, window_bounds = array<i64: 128, 128>}, {pipeline_mode = #tpu.pipeline_mode<synchronous>, transform_indices = @transform_4, window_bounds = array<i64: 1, 128>}, {pipeline_mode = #tpu.pipeline_mode<synchronous>, transform_indices = @transform_5, window_bounds = array<i64: 128, 128>}, {pipeline_mode = #tpu.pipeline_mode<synchronous>, transform_indices = @transform_6, window_bounds = array<i64: 1, 128>}, {transform_indices = @transform_7, window_bounds = array<i64: 8, 128>}]} {
    %c0 = arith.constant 0 : index
    %c0_0 = arith.constant 0 : index
    %0 = vector.load %arg1[%c0, %c0_0] : memref<8x512xbf16, #tpu.memory_space<vmem>>, vector<8x512xbf16>
    %c0_1 = arith.constant 0 : index
    %c0_2 = arith.constant 0 : index
    %1 = vector.load %arg2[%c0_1, %c0_2] : memref<512x128xbf16, #tpu.memory_space<vmem>>, vector<512x128xbf16>
    %cst = arith.constant dense<0.000000e+00> : vector<8x128xf32>
    %2 = tpu.matmul %0, %1, %cst {dimension_numbers = #tpu.dot_dimension_numbers<[1], [0], [0], [1], [0, 0, 1, 1], [], []>} : vector<8x512xbf16>, vector<512x128xbf16>, vector<8x128xf32> -> vector<8x128xf32>
    %c0_3 = arith.constant 0 : index
    %c0_4 = arith.constant 0 : index
    %3 = vector.load %arg3[%c0_3, %c0_4] : memref<1x128xf32, #tpu.memory_space<vmem>>, vector<1x128xf32>
    %4 = vector.broadcast %3 : vector<1x128xf32> to vector<8x128xf32>
    %5 = arith.addf %2, %4 : vector<8x128xf32>
    %cst_5 = arith.constant 0.000000e+00 : f32
    %6 = vector.broadcast %cst_5 : f32 to vector<8x128xf32>
    %7 = arith.maximumf %5, %6 : vector<8x128xf32>
    %8 = arith.truncf %7 : vector<8x128xf32> to vector<8x128xbf16>
    %c0_6 = arith.constant 0 : index
    %c0_7 = arith.constant 0 : index
    %9 = vector.load %arg4[%c0_6, %c0_7] : memref<128x128xbf16, #tpu.memory_space<vmem>>, vector<128x128xbf16>
    %cst_8 = arith.constant dense<0.000000e+00> : vector<8x128xf32>
    %10 = tpu.matmul %8, %9, %cst_8 {dimension_numbers = #tpu.dot_dimension_numbers<[1], [0], [0], [1], [0, 0, 1, 1], [], []>} : vector<8x128xbf16>, vector<128x128xbf16>, vector<8x128xf32> -> vector<8x128xf32>
    %c0_9 = arith.constant 0 : index
    %c0_10 = arith.constant 0 : index
    %11 = vector.load %arg5[%c0_9, %c0_10] : memref<1x128xf32, #tpu.memory_space<vmem>>, vector<1x128xf32>
    %12 = vector.broadcast %11 : vector<1x128xf32> to vector<8x128xf32>
    %13 = arith.addf %10, %12 : vector<8x128xf32>
    %cst_11 = arith.constant 0.000000e+00 : f32
    %14 = vector.broadcast %cst_11 : f32 to vector<8x128xf32>
    %15 = arith.maximumf %13, %14 : vector<8x128xf32>
    %16 = arith.truncf %15 : vector<8x128xf32> to vector<8x128xbf16>
    %c0_12 = arith.constant 0 : index
    %c0_13 = arith.constant 0 : index
    %17 = vector.load %arg6[%c0_12, %c0_13] : memref<128x128xbf16, #tpu.memory_space<vmem>>, vector<128x128xbf16>
    %cst_14 = arith.constant dense<0.000000e+00> : vector<8x128xf32>
    %18 = tpu.matmul %16, %17, %cst_14 {dimension_numbers = #tpu.dot_dimension_numbers<[1], [0], [0], [1], [0, 0, 1, 1], [], []>} : vector<8x128xbf16>, vector<128x128xbf16>, vector<8x128xf32> -> vector<8x128xf32>
    %c0_15 = arith.constant 0 : index
    %c0_16 = arith.constant 0 : index
    %19 = vector.load %arg7[%c0_15, %c0_16] : memref<1x128xf32, #tpu.memory_space<vmem>>, vector<1x128xf32>
    %20 = vector.broadcast %19 : vector<1x128xf32> to vector<8x128xf32>
    %21 = arith.addf %18, %20 : vector<8x128xf32>
    %c0_17 = arith.constant 0 : index
    %c0_18 = arith.constant 0 : index
    %22 = vector.load %arg8[%c0_17, %c0_18] : memref<8x128xf32, #tpu.memory_space<vmem>>, vector<8x128xf32>
    tpu.vector_store %arg8[%c0_17, %c0_18], %21 {strides = array<i32>} : memref<8x128xf32, #tpu.memory_space<vmem>>, vector<8x128xf32>,
    return
  }
  func.func @transform_0(%arg0: i32) -> (i32, i32) {
    %c0_i32 = arith.constant 0 : i32
    %c0_i32_0 = arith.constant 0 : i32
    return %arg0, %c0_i32 : i32, i32
  }
  func.func @transform_1(%arg0: i32) -> (i32, i32) {
    %c0_i32 = arith.constant 0 : i32
    %c0_i32_0 = arith.constant 0 : i32
    %c0_i32_1 = arith.constant 0 : i32
    return %c0_i32, %c0_i32_0 : i32, i32
  }
  func.func @transform_2(%arg0: i32) -> (i32, i32) {
    %c0_i32 = arith.constant 0 : i32
    %c0_i32_0 = arith.constant 0 : i32
    %c0_i32_1 = arith.constant 0 : i32
    return %c0_i32, %c0_i32_0 : i32, i32
  }
  func.func @transform_3(%arg0: i32) -> (i32, i32) {
    %c0_i32 = arith.constant 0 : i32
    %c0_i32_0 = arith.constant 0 : i32
    %c0_i32_1 = arith.constant 0 : i32
    return %c0_i32, %c0_i32_0 : i32, i32
  }
  func.func @transform_4(%arg0: i32) -> (i32, i32) {
    %c0_i32 = arith.constant 0 : i32
    %c0_i32_0 = arith.constant 0 : i32
    %c0_i32_1 = arith.constant 0 : i32
    return %c0_i32, %c0_i32_0 : i32, i32
  }
  func.func @transform_5(%arg0: i32) -> (i32, i32) {
    %c0_i32 = arith.constant 0 : i32
    %c0_i32_0 = arith.constant 0 : i32
    %c0_i32_1 = arith.constant 0 : i32
    return %c0_i32, %c0_i32_0 : i32, i32
  }
  func.func @transform_6(%arg0: i32) -> (i32, i32) {
    %c0_i32 = arith.constant 0 : i32
    %c0_i32_0 = arith.constant 0 : i32
    %c0_i32_1 = arith.constant 0 : i32
    return %c0_i32, %c0_i32_0 : i32, i32
  }
  func.func @transform_7(%arg0: i32) -> (i32, i32) {
    %c0_i32 = arith.constant 0 : i32
    %c0_i32_0 = arith.constant 0 : i32
    return %arg0, %c0_i32 : i32, i32
  }
}

</mosaic_0001>

<bundles_post_ra>
// kernel: cnn_forward.3
= control target key start
LH: loop header
LB: loop body
LE: loop exit
PB: predicated region body
PF: predicated region fallthrough
CT: control target
= control target key end

     0   :  { %v1254_v1 = vmov 0   ;;  %vm142_vm0 = vcmask 1044480   ;;  %vm143_vm1 = vcmask 1045504   ;;  %v1255_v10 = vmov 65535   ;;  %s1582_s0 = inlined_call_operand.vmem [shape: bf16[4,75,512], index: 0, kind: input, shape index: {}]   ;;  %s1583_s1 = inlined_call_operand.vmem [shape: bf16[16,75], index: 1, kind: input, shape index: {}]   ;;  %s1584_s2 = inlined_call_operand.vmem [shape: f32[16,1], index: 2, kind: input, shape index: {}]   ;;  %s1585_s3 = inlined_call_operand.vmem [shape: bf16[16,512], index: 3, kind: output, shape index: {}]  }
   0x1   :  { %v1133_v0 = vld [vmem:[%s1582_s0 + $0x4] ss:$16 sps:$4 sm:$0xff]   ;;  %190 = vmatprep.mubr.bf16.mxu0 %v1254_v1  ;;  %233 = vmatprep.mubr.bf16.mxu1 %v1254_v1  ;;  %v1135_v2 = vld [vmem:[%s1582_s0 + $0xc] ss:$16 sps:$4 sm:$0xff]   ;;  %v1137_v3 = vld [vmem:[%s1582_s0] ss:$16 sps:$4 sm:$0xff]  }
   0x2   :  { %1132 = vset.pattern.permute.xlu0 %v1254_v1  ;;  %158 = vmatprep.subr.bf16.mxu0 %v1133_v0  ;;  %v1138_v4 = vld [vmem:[%s1582_s0 + $0x8] ss:$16 sps:$4 sm:$0xff]   ;;  %v1139_v5 = vld [vmem:[%s1582_s0 + $0x24] ss:$16 sps:$4 sm:$0xff]   ;;  %v1141_v6 = vld [vmem:[%s1582_s0 + $0x2c] ss:$16 sps:$4 sm:$0xff]  }
   0x3   :  { %201 = vmatprep.subr.bf16.mxu1 %v1135_v2  ;;  %159 = vmatpush1.bf16.msra.mxu0 %v1137_v3  ;;  %v1143_v7 = vld [vmem:[%s1582_s0 + $0x20] ss:$16 sps:$4 sm:$0xff]   ;;  %v1144_v8 = vld [vmem:[%s1582_s0 + $0x28] ss:$16 sps:$4 sm:$0xff]   ;;  %v1145_v9 = vld [vmem:[%s1582_s0 + $0x44] ss:$16 sps:$4 sm:$0xff]  }
   0x4   :  { %202 = vmatpush1.bf16.msra.mxu1 %v1138_v4  ;;  %160 = vmatprep.subr.bf16.mxu0 %v1139_v5  ;;  %v144_v11 = vsel %vm142_vm0, 4294967295, %v1255_v10  ;;  %v1147_v12 = vld [vmem:[%s1582_s0 + $0x4c] ss:$16 sps:$4 sm:$0xff]   ;;  %v1149_v13 = vld [vmem:[%s1582_s0 + $0x40] ss:$16 sps:$4 sm:$0xff]   ;;  %vm138_vm2 = vcmask 613376  }
   0x5   :  { %203 = vmatprep.subr.bf16.mxu1 %v1141_v6  ;;  %v1150_v14 = vld [vmem:[%s1582_s0 + $0x48] ss:$16 sps:$4 sm:$0xff]   ;;  %v1151_v15 = vld [vmem:[%s1582_s0 + $0x64] ss:$16 sps:$4 sm:$0xff]   ;;  %v1153_v16 = vld [vmem:[%s1582_s0 + $0x6c] ss:$16 sps:$4 sm:$0xff]  }
   0x6   :  { %v1155_v17 = vld [vmem:[%s1582_s0 + $0x60] ss:$16 sps:$4 sm:$0xff]   ;;  %v1156_v18 = vld [vmem:[%s1582_s0 + $0x68] ss:$16 sps:$4 sm:$0xff]   ;;  %v1327_v19 = vsel %vm143_vm1, %v144_v11, 0 }
   0x7   :  { %161 = vmatpush1.bf16.msra.mxu0 %v1143_v7  ;;  %v1157_v20 = vld [vmem:[%s1582_s0 + $0x84] ss:$16 sps:$4 sm:$0x3f]   ;;  %v1159_v21 = vld [vmem:[%s1582_s0 + $0x8c] ss:$16 sps:$4 sm:$0x3f]  }
   0x8   :  { %204 = vmatpush1.bf16.msra.mxu1 %v1144_v8  ;;  %162 = vmatprep.subr.bf16.mxu0 %v1145_v9  ;;  %v150_v22 = vand.u32 %v1157_v20, %v1327_v19  ;;  %v1161_v23 = vld [vmem:[%s1582_s0 + $0x80] ss:$16 sps:$4 sm:$0x3f]   ;;  %v1162_v24 = vld [vmem:[%s1582_s0 + $0x88] ss:$16 sps:$4 sm:$0x3f]   ;;  %v156_v25 = vand.u32 %v1159_v21, %v1327_v19 }
   0x9   :  { %205 = vmatprep.subr.bf16.mxu1 %v1147_v12  ;;  %v147_v26 = vand.u32 %v1161_v23, %v1327_v19  ;;  %v153_v27 = vand.u32 %v1162_v24, %v1327_v19  ;;  %v1166_v28 = vld [vmem:[%s1582_s0 + $0xa4] ss:$16 sps:$4 sm:$0xff]   ;;  %v1169_v29 = vld [vmem:[%s1582_s0 + $0xac] ss:$16 sps:$4 sm:$0xff]   ;;  %v1164_v31 = vld [vmem:[%s1582_s0 + $0xa0] ss:$16 sps:$4 sm:$0xff]  }
   0xa   :  { %v1354_v30 = vld [vmem:[%s1583_s1] sm:$0xff]   ;;  %v1167_v32 = vld [vmem:[%s1582_s0 + $0xa8] ss:$16 sps:$4 sm:$0xff]   ;;  %v1175_v34 = vld [vmem:[%s1582_s0 + $0xcc] ss:$16 sps:$4 sm:$0xff]  }
   0xb   :  { %163 = vmatpush1.bf16.msra.mxu0 %v1149_v13  ;;  %v1172_v33 = vld [vmem:[%s1582_s0 + $0xc4] ss:$16 sps:$4 sm:$0xff]   ;;  %v1170_v35 = vld [vmem:[%s1582_s0 + $0xc0] ss:$16 sps:$4 sm:$0xff]   ;;  %v1173_v36 = vld [vmem:[%s1582_s0 + $0xc8] ss:$16 sps:$4 sm:$0xff]  }
   0xc   :  { %206 = vmatpush1.bf16.msra.mxu1 %v1150_v14  ;;  %164 = vmatprep.subr.bf16.mxu0 %v1151_v15  ;;  %v1178_v37 = vld [vmem:[%s1582_s0 + $0xe4] ss:$16 sps:$4 sm:$0xff]   ;;  %v1181_v38 = vld [vmem:[%s1582_s0 + $0xec] ss:$16 sps:$4 sm:$0xff]   ;;  %v1176_v39 = vld [vmem:[%s1582_s0 + $0xe0] ss:$16 sps:$4 sm:$0xff]  }
   0xd   :  { %207 = vmatprep.subr.bf16.mxu1 %v1153_v16  ;;  %v1179_v40 = vld [vmem:[%s1582_s0 + $0xe8] ss:$16 sps:$4 sm:$0xff]   ;;  %v1184_v41 = vld [vmem:[%s1582_s0 + $0x104] ss:$16 sps:$4 sm:$0xff]   ;;  %v1187_v43 = vld [vmem:[%s1582_s0 + $0x10c] ss:$16 sps:$4 sm:$0xff]  }
   0xe   :  { %v1190_v42 = vld [vmem:[%s1582_s0 + $0x124] ss:$16 sps:$4 sm:$0x3f]   ;;  %v1193_v44 = vld [vmem:[%s1582_s0 + $0x12c] ss:$16 sps:$4 sm:$0x3f]  }
   0xf   :  { %165 = vmatpush1.bf16.msra.mxu0 %v1155_v17  ;;  %v1182_v45 = vld [vmem:[%s1582_s0 + $0x100] ss:$16 sps:$4 sm:$0xff]   ;;  %v1185_v46 = vld [vmem:[%s1582_s0 + $0x108] ss:$16 sps:$4 sm:$0xff]   ;;  %v365_v49 = vand.u32 %v1190_v42, %v1327_v19  ;;  %v371_v50 = vand.u32 %v1193_v44, %v1327_v19  ;;  %v1196_v53 = vld [vmem:[%s1582_s0 + $0x144] ss:$16 sps:$4 sm:$0xff]  }
  0x10   :  { %208 = vmatpush1.bf16.msra.mxu1 %v1156_v18  ;;  %166 = vmatprep.subr.bf16.mxu0 %v150_v22  ;;  %v1188_v47 = vld [vmem:[%s1582_s0 + $0x120] ss:$16 sps:$4 sm:$0x3f]   ;;  %v1191_v48 = vld [vmem:[%s1582_s0 + $0x128] ss:$16 sps:$4 sm:$0x3f]  }
  0x11   :  { %209 = vmatprep.subr.bf16.mxu1 %v156_v25  ;;  %v362_v51 = vand.u32 %v1188_v47, %v1327_v19  ;;  %v368_v52 = vand.u32 %v1191_v48, %v1327_v19  ;;  %v1199_v54 = vld [vmem:[%s1582_s0 + $0x14c] ss:$16 sps:$4 sm:$0xff]   ;;  %v1194_v55 = vld [vmem:[%s1582_s0 + $0x140] ss:$16 sps:$4 sm:$0xff]   ;;  %v1197_v56 = vld [vmem:[%s1582_s0 + $0x148] ss:$16 sps:$4 sm:$0xff]  }
  0x12   :  { %v1202_v57 = vld [vmem:[%s1582_s0 + $0x164] ss:$16 sps:$4 sm:$0xff]   ;;  %v1205_v58 = vld [vmem:[%s1582_s0 + $0x16c] ss:$16 sps:$4 sm:$0xff]   ;;  %v1200_v59 = vld [vmem:[%s1582_s0 + $0x160] ss:$16 sps:$4 sm:$0xff]  }
  0x13   :  { %167 = vmatpush1.bf16.msra.mxu0 %v147_v26  ;;  %v1203_v60 = vld [vmem:[%s1582_s0 + $0x168] ss:$16 sps:$4 sm:$0xff]   ;;  %v1208_v61 = vld [vmem:[%s1582_s0 + $0x184] ss:$16 sps:$4 sm:$0xff]   ;;  %v1211_v62 = vld [vmem:[%s1582_s0 + $0x18c] ss:$16 sps:$4 sm:$0xff]  }
  0x14   :  { %210 = vmatpush1.bf16.msra.mxu1 %v153_v27  ;;  %373 = vmatprep.subr.bf16.mxu0 %v1166_v28  ;;  %v1206_v63 = vld [vmem:[%s1582_s0 + $0x180] ss:$16 sps:$4 sm:$0xff]   ;;  %v1209_v0 = vld [vmem:[%s1582_s0 + $0x188] ss:$16 sps:$4 sm:$0xff]   ;;  %v1214_v2 = vld [vmem:[%s1582_s0 + $0x1a4] ss:$16 sps:$4 sm:$0xff]  }
  0x15   :  { %416 = vmatprep.subr.bf16.mxu1 %v1169_v29  ;;  %v1220_v3 = vld [vmem:[%s1582_s0 + $0x1c4] ss:$16 sps:$4 sm:$0x3f]   ;;  %v1217_v4 = vld [vmem:[%s1582_s0 + $0x1ac] ss:$16 sps:$4 sm:$0xff]  }
  0x16   :  { %994 = vmatmul.mubr.msk.bf16.vlgmr.msra.gmra.mrb[0].mxu0 %vm138_vm2, %v1354_v30  ;;  %v1223_v5 = vld [vmem:[%s1582_s0 + $0x1cc] ss:$16 sps:$4 sm:$0x3f]   ;;  %v1212_v6 = vld [vmem:[%s1582_s0 + $0x1a0] ss:$16 sps:$4 sm:$0xff]   ;;  %v588_v10 = vand.u32 %v1220_v3, %v1327_v19 }
  0x17   :  { %995 = vmatmul.mubr.msk.bf16.vlgmr.msra.gmra.mrb[0].mxu1 %vm138_vm2, %v1354_v30  ;;  %374 = vmatpush1.bf16.msra.mxu0 %v1164_v31  ;;  %v1218_v7 = vld [vmem:[%s1582_s0 + $0x1c0] ss:$16 sps:$4 sm:$0x3f]   ;;  %v1215_v8 = vld [vmem:[%s1582_s0 + $0x1a8] ss:$16 sps:$4 sm:$0xff]   ;;  %v594_v11 = vand.u32 %v1223_v5, %v1327_v19 }
  0x18   :  { %417 = vmatpush1.bf16.msra.mxu1 %v1167_v32  ;;  %375 = vmatprep.subr.bf16.mxu0 %v1172_v33  ;;  %v1221_v9 = vld [vmem:[%s1582_s0 + $0x1c8] ss:$16 sps:$4 sm:$0x3f]   ;;  %v913_v12 = vld [vmem:[%s1584_s2] sm:$0xff]  ;;  %v585_v13 = vand.u32 %v1218_v7, %v1327_v19  ;;  %v1229_v17 = vld [vmem:[%s1582_s0 + $0x1ec] ss:$16 sps:$4 sm:$0xff]  }
  0x19   :  { %418 = vmatprep.subr.bf16.mxu1 %v1175_v34  ;;  %405 = vmatprep.mubr.bf16.mxu0 %v1254_v1  ;;  %v591_v14 = vand.u32 %v1221_v9, %v1327_v19  ;;  %v914_v15 = vld [vmem:[%s1584_s2 + $0x8] sm:$0xff]  ;;  %v1226_v16 = vld [vmem:[%s1582_s0 + $0x1e4] ss:$16 sps:$4 sm:$0xff]   ;;  %v1224_v18 = vld [vmem:[%s1582_s0 + $0x1e0] ss:$16 sps:$4 sm:$0xff]  }
  0x1a   :  { %448 = vmatprep.mubr.bf16.mxu1 %v1254_v1  ;;  %917 = vperm.xlu0 %1132, %v913_v12   ;;  %v1227_v20 = vld [vmem:[%s1582_s0 + $0x1e8] ss:$16 sps:$4 sm:$0xff]   ;;  %v1232_v21 = vld [vmem:[%s1582_s0 + $0x204] ss:$16 sps:$4 sm:$0xff]   ;;  %v1235_v22 = vld [vmem:[%s1582_s0 + $0x20c] ss:$16 sps:$4 sm:$0xff]  }
  0x1b   :  { %376 = vmatpush1.bf16.msra.mxu0 %v1170_v35  ;;  %v1230_v23 = vld [vmem:[%s1582_s0 + $0x200] ss:$16 sps:$4 sm:$0xff]   ;;  %v1233_v24 = vld [vmem:[%s1582_s0 + $0x208] ss:$16 sps:$4 sm:$0xff]   ;;  %v1238_v25 = vld [vmem:[%s1582_s0 + $0x224] ss:$16 sps:$4 sm:$0xff]  }
  0x1c   :  { %419 = vmatpush1.bf16.msra.mxu1 %v1173_v36  ;;  %377 = vmatprep.subr.bf16.mxu0 %v1178_v37  ;;  %v1241_v26 = vld [vmem:[%s1582_s0 + $0x22c] ss:$16 sps:$4 sm:$0xff]   ;;  %v1236_v27 = vld [vmem:[%s1582_s0 + $0x220] ss:$16 sps:$4 sm:$0xff]   ;;  %v1239_v28 = vld [vmem:[%s1582_s0 + $0x228] ss:$16 sps:$4 sm:$0xff]  }
  0x1d   :  { %420 = vmatprep.subr.bf16.mxu1 %v1181_v38  ;;  %v1244_v29 = vld [vmem:[%s1582_s0 + $0x244] ss:$16 sps:$4 sm:$0xff]   ;;  %v1247_v31 = vld [vmem:[%s1582_s0 + $0x24c] ss:$16 sps:$4 sm:$0xff]   ;;  %v1242_v33 = vld [vmem:[%s1582_s0 + $0x240] ss:$16 sps:$4 sm:$0xff]  }
  0x1e   :  { %922 = vperm.xlu0 %1132, %v914_v15   ;;  %v1253_v32 = vld [vmem:[%s1582_s0 + $0x26c] ss:$16 sps:$4 sm:$0x3f]   ;;  %v1245_v34 = vld [vmem:[%s1582_s0 + $0x248] ss:$16 sps:$4 sm:$0xff]  }
  0x1f   :  { %378 = vmatpush1.bf16.msra.mxu0 %v1176_v39  ;;  %v1248_v35 = vld [vmem:[%s1582_s0 + $0x260] ss:$16 sps:$4 sm:$0x3f]   ;;  %v1251_v36 = vld [vmem:[%s1582_s0 + $0x268] ss:$16 sps:$4 sm:$0x3f]   ;;  %v817_v38 = vand.u32 %v1253_v32, %v1327_v19 }
  0x20   :  { %421 = vmatpush1.bf16.msra.mxu1 %v1179_v40  ;;  %379 = vmatprep.subr.bf16.mxu0 %v1184_v41  ;;  %v808_v39 = vand.u32 %v1248_v35, %v1327_v19  ;;  %v814_v40 = vand.u32 %v1251_v36, %v1327_v19 }
  0x21   :  { %422 = vmatprep.subr.bf16.mxu1 %v1187_v43 }
  0x23   :  { %380 = vmatpush1.bf16.msra.mxu0 %v1182_v45 }
  0x24   :  { %423 = vmatpush1.bf16.msra.mxu1 %v1185_v46  ;;  %381 = vmatprep.subr.bf16.mxu0 %v365_v49 }
  0x25   :  { %424 = vmatprep.subr.bf16.mxu1 %v371_v50 }
  0x27   :  { %382 = vmatpush1.bf16.msra.mxu0 %v362_v51 }
  0x28   :  { %425 = vmatpush1.bf16.msra.mxu1 %v368_v52  ;;  %596 = vmatprep.subr.bf16.mxu0 %v1196_v53 }
  0x29   :  { %639 = vmatprep.subr.bf16.mxu1 %v1199_v54 }
  0x2a   :  { %1036 = vmatmul.mubr.msk.bf16.vlgmr.msra.gmra.mrb[4].mxu0 %vm138_vm2, %v1354_v30 }
  0x2b   :  { %1037 = vmatmul.mubr.msk.bf16.vlgmr.msra.gmra.mrb[4].mxu1 %vm138_vm2, %v1354_v30  ;;  %597 = vmatpush1.bf16.msra.mxu0 %v1194_v55 }
  0x2c   :  { %640 = vmatpush1.bf16.msra.mxu1 %v1197_v56  ;;  %598 = vmatprep.subr.bf16.mxu0 %v1202_v57 }
  0x2d   :  { %641 = vmatprep.subr.bf16.mxu1 %v1205_v58  ;;  %628 = vmatprep.mubr.bf16.mxu0 %v1254_v1 }
  0x2e   :  { %671 = vmatprep.mubr.bf16.mxu1 %v1254_v1 }
  0x2f   :  { %599 = vmatpush1.bf16.msra.mxu0 %v1200_v59 }
  0x30   :  { %642 = vmatpush1.bf16.msra.mxu1 %v1203_v60  ;;  %600 = vmatprep.subr.bf16.mxu0 %v1208_v61 }
  0x31   :  { %643 = vmatprep.subr.bf16.mxu1 %v1211_v62 }
  0x33   :  { %601 = vmatpush1.bf16.msra.mxu0 %v1206_v63 }
  0x34   :  { %644 = vmatpush1.bf16.msra.mxu1 %v1209_v0  ;;  %602 = vmatprep.subr.bf16.mxu0 %v1214_v2 }
  0x35   :  { %645 = vmatprep.subr.bf16.mxu1 %v1217_v4 }
  0x37   :  { %603 = vmatpush1.bf16.msra.mxu0 %v1212_v6 }
  0x38   :  { %646 = vmatpush1.bf16.msra.mxu1 %v1215_v8  ;;  %604 = vmatprep.subr.bf16.mxu0 %v588_v10 }
  0x39   :  { %647 = vmatprep.subr.bf16.mxu1 %v594_v11 }
  0x3b   :  { %605 = vmatpush1.bf16.msra.mxu0 %v585_v13 }
  0x3c   :  { %648 = vmatpush1.bf16.msra.mxu1 %v591_v14  ;;  %819 = vmatprep.subr.bf16.mxu0 %v1226_v16 }
  0x3d   :  { %862 = vmatprep.subr.bf16.mxu1 %v1229_v17 }
  0x3e   :  { %1078 = vmatmul.mubr.msk.bf16.vlgmr.msra.gmra.mrb[8].mxu0 %vm138_vm2, %v1354_v30 }
  0x3f   :  { %1079 = vmatmul.mubr.msk.bf16.vlgmr.msra.gmra.mrb[8].mxu1 %vm138_vm2, %v1354_v30  ;;  %820 = vmatpush1.bf16.msra.mxu0 %v1224_v18 }
  0x40   :  { %863 = vmatpush1.bf16.msra.mxu1 %v1227_v20  ;;  %821 = vmatprep.subr.bf16.mxu0 %v1232_v21 }
  0x41   :  { %864 = vmatprep.subr.bf16.mxu1 %v1235_v22  ;;  %851 = vmatprep.mubr.bf16.mxu0 %v1254_v1 }
  0x42   :  { %894 = vmatprep.mubr.bf16.mxu1 %v1254_v1  ;;  %v1250_v1 = vld [vmem:[%s1582_s0 + $0x264] ss:$16 sps:$4 sm:$0x3f]  }
  0x43   :  { %822 = vmatpush1.bf16.msra.mxu0 %v1230_v23  ;;  %v811_v37 = vand.u32 %v1250_v1, %v1327_v19 }
  0x44   :  { %865 = vmatpush1.bf16.msra.mxu1 %v1233_v24  ;;  %823 = vmatprep.subr.bf16.mxu0 %v1238_v25 }
  0x45   :  { %866 = vmatprep.subr.bf16.mxu1 %v1241_v26 }
  0x47   :  { %824 = vmatpush1.bf16.msra.mxu0 %v1236_v27 }
  0x48   :  { %867 = vmatpush1.bf16.msra.mxu1 %v1239_v28  ;;  %825 = vmatprep.subr.bf16.mxu0 %v1244_v29 }
  0x49   :  { %868 = vmatprep.subr.bf16.mxu1 %v1247_v31 }
  0x4b   :  { %826 = vmatpush1.bf16.msra.mxu0 %v1242_v33 }
  0x4c   :  { %869 = vmatpush1.bf16.msra.mxu1 %v1245_v34  ;;  %827 = vmatprep.subr.bf16.mxu0 %v811_v37 }
  0x4d   :  { %870 = vmatprep.subr.bf16.mxu1 %v817_v38 }
  0x4f   :  { %828 = vmatpush1.bf16.msra.mxu0 %v808_v39 }
  0x50   :  { %871 = vmatpush1.bf16.msra.mxu1 %v814_v40 }
  0x52   :  { %1120 = vmatmul.mubr.msk.bf16.vlgmr.msra.gmra.mrb[12].mxu0 %vm138_vm2, %v1354_v30 }
  0x53   :  { %1121 = vmatmul.mubr.msk.bf16.vlgmr.msra.gmra.mrb[12].mxu1 %vm138_vm2, %v1354_v30 }
  0x99   :  { %v918_v16 = vpop.permute.xlu0 %917 }
  0x9d   :  { %v923_v34 = vpop.permute.xlu0 %922 }
  0xe9   :  { %v192_v41 = vpop.f32.mrb[0].mxu0 }
  0xea   :  { %v235_v42 = vpop.f32.mrb[0].mxu1  ;;  %v194_v43 = vpop.f32.mrb[1].mxu0 }
  0xeb   :  { %v237_v44 = vpop.f32.mrb[1].mxu1  ;;  %v196_v45 = vpop.f32.mrb[2].mxu0 }
  0xec   :  { %v239_v46 = vpop.f32.mrb[2].mxu1  ;;  %v198_v47 = vpop.f32.mrb[3].mxu0 }
  0xed   :  { %v241_v48 = vpop.f32.mrb[3].mxu1 }
  0xfd   :  { %v407_v49 = vpop.f32.mrb[4].mxu0 }
  0xfe   :  { %v450_v19 = vpop.f32.mrb[4].mxu1  ;;  %v459_v50 = vmax.f32 %v192_v41, %v407_v49  ;;  %v409_v52 = vpop.f32.mrb[5].mxu0 }
  0xff   :  { %v461_v51 = vmax.f32 %v235_v42, %v450_v19  ;;  %v452_v53 = vpop.f32.mrb[5].mxu1  ;;  %v460_v54 = vmax.f32 %v194_v43, %v409_v52  ;;  %v411_v56 = vpop.f32.mrb[6].mxu0 }
 0x100   :  { %v462_v55 = vmax.f32 %v237_v44, %v452_v53  ;;  %v454_v57 = vpop.f32.mrb[6].mxu1  ;;  %v463_v58 = vmax.f32 %v196_v45, %v411_v56  ;;  %v413_v59 = vpop.f32.mrb[7].mxu0 }
 0x101   :  { %v465_v30 = vmax.f32 %v239_v46, %v454_v57  ;;  %v456_v60 = vpop.f32.mrb[7].mxu1  ;;  %v464_v61 = vmax.f32 %v198_v47, %v413_v59 }
 0x102   :  { %v466_v62 = vmax.f32 %v241_v48, %v456_v60 }
 0x111   :  { %v630_v63 = vpop.f32.mrb[8].mxu0 }
 0x112   :  { %v673_v0 = vpop.f32.mrb[8].mxu1  ;;  %v682_v2 = vmax.f32 %v459_v50, %v630_v63  ;;  %v632_v4 = vpop.f32.mrb[9].mxu0 }
 0x113   :  { %v684_v3 = vmax.f32 %v461_v51, %v673_v0  ;;  %v675_v5 = vpop.f32.mrb[9].mxu1  ;;  %v683_v6 = vmax.f32 %v460_v54, %v632_v4  ;;  %v634_v8 = vpop.f32.mrb[10].mxu0 }
 0x114   :  { %v685_v7 = vmax.f32 %v462_v55, %v675_v5  ;;  %v677_v9 = vpop.f32.mrb[10].mxu1  ;;  %v686_v10 = vmax.f32 %v463_v58, %v634_v8  ;;  %v636_v12 = vpop.f32.mrb[11].mxu0 }
 0x115   :  { %v688_v11 = vmax.f32 %v465_v30, %v677_v9  ;;  %v679_v13 = vpop.f32.mrb[11].mxu1  ;;  %v687_v14 = vmax.f32 %v464_v61, %v636_v12 }
 0x116   :  { %v689_v15 = vmax.f32 %v466_v62, %v679_v13 }
 0x125   :  { %v853_v17 = vpop.f32.mrb[12].mxu0 }
 0x126   :  { %v896_v18 = vpop.f32.mrb[12].mxu1  ;;  %v905_v20 = vmax.f32 %v682_v2, %v853_v17  ;;  %v855_v22 = vpop.f32.mrb[13].mxu0 }
 0x127   :  { %v907_v21 = vmax.f32 %v684_v3, %v896_v18  ;;  %v898_v23 = vpop.f32.mrb[13].mxu1  ;;  %v906_v24 = vmax.f32 %v683_v6, %v855_v22  ;;  %v857_v26 = vpop.f32.mrb[14].mxu0 }
 0x128   :  { %v908_v25 = vmax.f32 %v685_v7, %v898_v23  ;;  %v900_v27 = vpop.f32.mrb[14].mxu1  ;;  %v925_v28 = vadd.f32 %v918_v16, %v905_v20  ;;  %v909_v31 = vmax.f32 %v686_v10, %v857_v26  ;;  %v859_v32 = vpop.f32.mrb[15].mxu0 }
 0x129   :  { %v927_v29 = vadd.f32 %v918_v16, %v907_v21  ;;  %v911_v1 = vmax.f32 %v688_v11, %v900_v27  ;;  %v902_v33 = vpop.f32.mrb[15].mxu1  ;;  %v926_v35 = vadd.f32 %v918_v16, %v906_v24  ;;  %v910_v37 = vmax.f32 %v687_v14, %v859_v32 }
 0x12a   :  { %v928_v36 = vadd.f32 %v918_v16, %v908_v25  ;;  %v912_v38 = vmax.f32 %v689_v15, %v902_v33  ;;  %v933_v39 = vmax.f32 %v925_v28, 0.0  ;;  %v929_v41 = vadd.f32 %v923_v34, %v909_v31 }
 0x12b   :  { %v935_v40 = vmax.f32 %v927_v29, 0.0  ;;  %v931_v42 = vadd.f32 %v923_v34, %v911_v1  ;;  %v934_v43 = vmax.f32 %v926_v35, 0.0  ;;  %v930_v45 = vadd.f32 %v923_v34, %v910_v37 }
 0x12c   :  { %v936_v44 = vmax.f32 %v928_v36, 0.0  ;;  %v932_v46 = vadd.f32 %v923_v34, %v912_v38  ;;  %v937_v47 = vmax.f32 %v929_v41, 0.0 }
 0x12d   :  { %v939_v48 = vmax.f32 %v931_v42, 0.0  ;;  %v1126_v49 = vpack.c.bf16 %v934_v43, %v933_v39  ;;  %v938_v50 = vmax.f32 %v930_v45, 0.0 }
 0x12e   :  { %v1127_v19 = vpack.c.bf16 %v936_v44, %v935_v40  ;;  %v940_v51 = vmax.f32 %v932_v46, 0.0 }
 0x12f   :  { %965 = vst [vmem:[%s1585_s3] sm:$0xff] %v1126_v49  ;;  %v1128_v52 = vpack.c.bf16 %v938_v50, %v937_v47 }
 0x130   :  { %966 = vst [vmem:[%s1585_s3 + $0x8] sm:$0xff] %v1127_v19  ;;  %v1129_v53 = vpack.c.bf16 %v940_v51, %v939_v48 }
 0x131   :  { %967 = vst [vmem:[%s1585_s3 + $0x10] sm:$0xff] %v1128_v52 }
 0x132   :  { %968 = vst [vmem:[%s1585_s3 + $0x18] sm:$0xff] %v1129_v53 }

// kernel: cnn_forward.4
= control target key start
LH: loop header
LB: loop body
LE: loop exit
PB: predicated region body
PF: predicated region fallthrough
CT: control target
= control target key end

     0   :  { %v707_v0 = vmov 0   ;;  %vm102_vm0 = vcmask 179200   ;;  %vm106_vm1 = vcmask 1042432   ;;  %s918_s0 = inlined_call_operand.vmem [shape: bf16[4,150,128], index: 0, kind: input, shape index: {}]   ;;  %s919_s1 = inlined_call_operand.vmem [shape: bf16[16,150], index: 1, kind: input, shape index: {}]   ;;  %s920_s2 = inlined_call_operand.vmem [shape: f32[16,1], index: 2, kind: input, shape index: {}]   ;;  %s921_s3 = inlined_call_operand.vmem [shape: bf16[16,128], index: 3, kind: output, shape index: {}]  }
   0x1   :  { %110 = vmatprep.subr.bf16.mxu0 %v707_v0  ;;  %231 = vmatprep.subr.bf16.mxu1 %v707_v0  ;;  %v664_v1 = vld [vmem:[%s918_s0] sm:$0xff]   ;;  %v665_v2 = vld [vmem:[%s918_s0 + $0x4c] sm:$0xff]   ;;  %v667_v4 = vld [vmem:[%s918_s0 + $0x54] sm:$0xff]  }
   0x2   :  { %663 = vset.pattern.permute.xlu0 %v707_v0  ;;  %111 = vmatpush1.bf16.msra.mxu0 %v664_v1  ;;  %v666_v3 = vld [vmem:[%s918_s0 + $0x8] sm:$0xff]   ;;  %v668_v5 = vld [vmem:[%s918_s0 + $0x10] sm:$0xff]   ;;  %v669_v6 = vld [vmem:[%s918_s0 + $0x5c] sm:$0xff]  }
   0x3   :  { %232 = vmatpush1.bf16.msra.mxu1 %v665_v2  ;;  %112 = vmatprep.subr.bf16.mxu0 %v707_v0  ;;  %v670_v7 = vld [vmem:[%s918_s0 + $0x18] sm:$0xff]   ;;  %v671_v8 = vld [vmem:[%s918_s0 + $0x64] sm:$0xff]   ;;  %v673_v10 = vld [vmem:[%s918_s0 + $0x6c] sm:$0xff]  }
   0x4   :  { %233 = vmatprep.subr.bf16.mxu1 %v707_v0  ;;  %v672_v9 = vld [vmem:[%s918_s0 + $0x20] sm:$0xff]   ;;  %v674_v11 = vld [vmem:[%s918_s0 + $0x28] sm:$0xff]   ;;  %v675_v12 = vld [vmem:[%s918_s0 + $0x74] sm:$0xff]  }
   0x5   :  { %v684_v13 = vld [vmem:[%s919_s1 + $0x4] ss:$8 sps:$4 sm:$0xff]   ;;  %v676_v14 = vld [vmem:[%s918_s0 + $0x30] sm:$0xff]   ;;  %v677_v15 = vld [vmem:[%s918_s0 + $0x7c] sm:$0xff]  }
   0x6   :  { %113 = vmatpush1.bf16.msra.mxu0 %v666_v3  ;;  %562 = vmatprep.mubr.msk.bf16.mxu0 %vm102_vm0, %v684_v13  ;;  %v678_v16 = vld [vmem:[%s918_s0 + $0x38] sm:$0xff]   ;;  %v679_v17 = vld [vmem:[%s918_s0 + $0x84] sm:$0xff]   ;;  %v683_v20 = vld [vmem:[%s918_s0 + $0x94] ss:$0 sps:$4 sm:$0x77]  }
   0x7   :  { %234 = vmatpush1.bf16.msra.mxu1 %v667_v4  ;;  %114 = vmatprep.subr.bf16.mxu0 %v707_v0  ;;  %v682_v18 = vld [vmem:[%s918_s0 + $0x48] ss:$0 sps:$4 sm:$0x77]   ;;  %v680_v19 = vld [vmem:[%s918_s0 + $0x40] sm:$0xff]   ;;  %v681_v21 = vld [vmem:[%s918_s0 + $0x8c] sm:$0xff]   ;;  %v229_v23 = vsel %vm106_vm1, %v683_v20, 0 }
   0x8   :  { %235 = vmatprep.subr.bf16.mxu1 %v707_v0  ;;  %592 = vmatprep.mubr.msk.bf16.mxu1 %vm102_vm0, %v684_v13  ;;  %v108_v22 = vsel %vm106_vm1, %v682_v18, 0  ;;  %v819_v24 = vld [vmem:[%s919_s1] ss:$8 sps:$4 sm:$0xff]   ;;  %v687_v25 = vld [vmem:[%s918_s0 + $0x98] sm:$0xff]   ;;  %v690_v30 = vld [vmem:[%s918_s0 + $0xec] sm:$0xff]  }
   0x9   :  { %v688_v26 = vld [vmem:[%s918_s0 + $0xe4] sm:$0xff]   ;;  %v692_v32 = vld [vmem:[%s918_s0 + $0xf4] sm:$0xff]   ;;  %v694_v34 = vld [vmem:[%s918_s0 + $0xfc] sm:$0xff]  }
   0xa   :  { %115 = vmatpush1.bf16.msra.mxu0 %v668_v5  ;;  %v520_v27 = vld [vmem:[%s920_s2] sm:$0xff]  ;;  %v521_v29 = vld [vmem:[%s920_s2 + $0x8] sm:$0xff]  ;;  %v693_v33 = vld [vmem:[%s918_s0 + $0xb0] sm:$0xff]  }
   0xb   :  { %236 = vmatpush1.bf16.msra.mxu1 %v669_v6  ;;  %116 = vmatprep.subr.bf16.mxu0 %v707_v0  ;;  %v689_v28 = vld [vmem:[%s918_s0 + $0xa0] sm:$0xff]   ;;  %v691_v31 = vld [vmem:[%s918_s0 + $0xa8] sm:$0xff]   ;;  %v695_v35 = vld [vmem:[%s918_s0 + $0xb8] sm:$0xff]  }
   0xc   :  { %237 = vmatprep.subr.bf16.mxu1 %v707_v0  ;;  %524 = vperm.xlu0 %663, %v520_v27   ;;  %v696_v36 = vld [vmem:[%s918_s0 + $0x104] sm:$0xff]   ;;  %v698_v38 = vld [vmem:[%s918_s0 + $0x10c] sm:$0xff]   ;;  %v700_v40 = vld [vmem:[%s918_s0 + $0x114] sm:$0xff]  }
   0xd   :  { %v697_v37 = vld [vmem:[%s918_s0 + $0xc0] sm:$0xff]   ;;  %v699_v39 = vld [vmem:[%s918_s0 + $0xc8] sm:$0xff]   ;;  %v701_v41 = vld [vmem:[%s918_s0 + $0xd0] sm:$0xff]  }
   0xe   :  { %117 = vmatpush1.bf16.msra.mxu0 %v670_v7  ;;  %v702_v42 = vld [vmem:[%s918_s0 + $0x11c] sm:$0xff]   ;;  %v704_v44 = vld [vmem:[%s918_s0 + $0x124] sm:$0xff]   ;;  %v706_v46 = vld [vmem:[%s918_s0 + $0x12c] ss:$0 sps:$4 sm:$0x77]  }
   0xf   :  { %238 = vmatpush1.bf16.msra.mxu1 %v671_v8  ;;  %118 = vmatprep.subr.bf16.mxu0 %v707_v0  ;;  %v703_v43 = vld [vmem:[%s918_s0 + $0xd8] sm:$0xff]   ;;  %v705_v45 = vld [vmem:[%s918_s0 + $0xe0] ss:$0 sps:$4 sm:$0x77]   ;;  %v475_v48 = vsel %vm106_vm1, %v706_v46, 0 }
  0x10   :  { %239 = vmatprep.subr.bf16.mxu1 %v707_v0  ;;  %529 = vperm.xlu0 %663, %v521_v29   ;;  %v352_v47 = vsel %vm106_vm1, %v705_v45, 0 }
  0x12   :  { %119 = vmatpush1.bf16.msra.mxu0 %v672_v9 }
  0x13   :  { %240 = vmatpush1.bf16.msra.mxu1 %v673_v10  ;;  %120 = vmatprep.subr.bf16.mxu0 %v707_v0 }
  0x14   :  { %241 = vmatprep.subr.bf16.mxu1 %v707_v0 }
  0x16   :  { %121 = vmatpush1.bf16.msra.mxu0 %v674_v11 }
  0x17   :  { %242 = vmatpush1.bf16.msra.mxu1 %v675_v12  ;;  %122 = vmatprep.subr.bf16.mxu0 %v707_v0 }
  0x18   :  { %243 = vmatprep.subr.bf16.mxu1 %v707_v0 }
  0x1a   :  { %123 = vmatpush1.bf16.msra.mxu0 %v676_v14 }
  0x1b   :  { %244 = vmatpush1.bf16.msra.mxu1 %v677_v15  ;;  %124 = vmatprep.subr.bf16.mxu0 %v707_v0 }
  0x1c   :  { %245 = vmatprep.subr.bf16.mxu1 %v707_v0 }
  0x1e   :  { %125 = vmatpush1.bf16.msra.mxu0 %v678_v16 }
  0x1f   :  { %246 = vmatpush1.bf16.msra.mxu1 %v679_v17  ;;  %126 = vmatprep.subr.bf16.mxu0 %v707_v0 }
  0x20   :  { %247 = vmatprep.subr.bf16.mxu1 %v707_v0 }
  0x22   :  { %127 = vmatpush1.bf16.msra.mxu0 %v680_v19 }
  0x23   :  { %248 = vmatpush1.bf16.msra.mxu1 %v681_v21  ;;  %128 = vmatprep.subr.bf16.mxu0 %v707_v0 }
  0x24   :  { %249 = vmatprep.subr.bf16.mxu1 %v707_v0 }
  0x26   :  { %129 = vmatpush1.bf16.msra.mxu0 %v108_v22 }
  0x27   :  { %250 = vmatpush1.bf16.msra.mxu1 %v229_v23  ;;  %354 = vmatprep.subr.bf16.mxu0 %v707_v0 }
  0x28   :  { %477 = vmatprep.subr.bf16.mxu1 %v707_v0 }
  0x29   :  { %143 = vmatmul.mubr.bf16.vlgmr.msra.gmra.mrb[0].mxu0 %v819_v24 }
  0x2a   :  { %264 = vmatmul.mubr.bf16.vlgmr.msra.gmra.mrb[0].mxu1 %v819_v24  ;;  %355 = vmatpush1.bf16.msra.mxu0 %v687_v25 }
  0x2b   :  { %478 = vmatpush1.bf16.msra.mxu1 %v688_v26  ;;  %356 = vmatprep.subr.bf16.mxu0 %v707_v0 }
  0x2c   :  { %479 = vmatprep.subr.bf16.mxu1 %v707_v0  ;;  %622 = vmatprep.mubr.msk.bf16.mxu0 %vm102_vm0, %v684_v13 }
  0x2d   :  { %652 = vmatprep.mubr.msk.bf16.mxu1 %vm102_vm0, %v684_v13 }
  0x2e   :  { %357 = vmatpush1.bf16.msra.mxu0 %v689_v28 }
  0x2f   :  { %480 = vmatpush1.bf16.msra.mxu1 %v690_v30  ;;  %358 = vmatprep.subr.bf16.mxu0 %v707_v0 }
  0x30   :  { %481 = vmatprep.subr.bf16.mxu1 %v707_v0 }
  0x32   :  { %359 = vmatpush1.bf16.msra.mxu0 %v691_v31 }
  0x33   :  { %482 = vmatpush1.bf16.msra.mxu1 %v692_v32  ;;  %360 = vmatprep.subr.bf16.mxu0 %v707_v0 }
  0x34   :  { %483 = vmatprep.subr.bf16.mxu1 %v707_v0 }
  0x36   :  { %361 = vmatpush1.bf16.msra.mxu0 %v693_v33 }
  0x37   :  { %484 = vmatpush1.bf16.msra.mxu1 %v694_v34  ;;  %362 = vmatprep.subr.bf16.mxu0 %v707_v0 }
  0x38   :  { %485 = vmatprep.subr.bf16.mxu1 %v707_v0 }
  0x3a   :  { %363 = vmatpush1.bf16.msra.mxu0 %v695_v35 }
  0x3b   :  { %486 = vmatpush1.bf16.msra.mxu1 %v696_v36  ;;  %364 = vmatprep.subr.bf16.mxu0 %v707_v0 }
  0x3c   :  { %487 = vmatprep.subr.bf16.mxu1 %v707_v0 }
  0x3e   :  { %365 = vmatpush1.bf16.msra.mxu0 %v697_v37 }
  0x3f   :  { %488 = vmatpush1.bf16.msra.mxu1 %v698_v38  ;;  %366 = vmatprep.subr.bf16.mxu0 %v707_v0 }
  0x40   :  { %489 = vmatprep.subr.bf16.mxu1 %v707_v0 }
  0x42   :  { %367 = vmatpush1.bf16.msra.mxu0 %v699_v39 }
  0x43   :  { %490 = vmatpush1.bf16.msra.mxu1 %v700_v40  ;;  %368 = vmatprep.subr.bf16.mxu0 %v707_v0 }
  0x44   :  { %491 = vmatprep.subr.bf16.mxu1 %v707_v0 }
  0x46   :  { %369 = vmatpush1.bf16.msra.mxu0 %v701_v41 }
  0x47   :  { %492 = vmatpush1.bf16.msra.mxu1 %v702_v42  ;;  %370 = vmatprep.subr.bf16.mxu0 %v707_v0 }
  0x48   :  { %493 = vmatprep.subr.bf16.mxu1 %v707_v0 }
  0x4a   :  { %371 = vmatpush1.bf16.msra.mxu0 %v703_v43 }
  0x4b   :  { %494 = vmatpush1.bf16.msra.mxu1 %v704_v44  ;;  %372 = vmatprep.subr.bf16.mxu0 %v707_v0 }
  0x4c   :  { %495 = vmatprep.subr.bf16.mxu1 %v707_v0 }
  0x4e   :  { %373 = vmatpush1.bf16.msra.mxu0 %v352_v47 }
  0x4f   :  { %496 = vmatpush1.bf16.msra.mxu1 %v475_v48 }
  0x51   :  { %387 = vmatmul.mubr.bf16.vlgmr.msra.gmra.mrb[4].mxu0 %v819_v24 }
  0x52   :  { %510 = vmatmul.mubr.bf16.vlgmr.msra.gmra.mrb[4].mxu1 %v819_v24 }
  0x8b   :  { %v525_v59 = vpop.permute.xlu0 %524 }
  0x8f   :  { %v530_v9 = vpop.permute.xlu0 %529 }
  0xfc   :  { %v144_v49 = vpop.f32.mrb[0].mxu0 }
  0xfd   :  { %v265_v50 = vpop.f32.mrb[0].mxu1  ;;  %v146_v51 = vpop.f32.mrb[1].mxu0 }
  0xfe   :  { %v272_v52 = vmax.f32 %v144_v49, %v265_v50  ;;  %v267_v53 = vpop.f32.mrb[1].mxu1  ;;  %v147_v54 = vpop.f32.mrb[2].mxu0 }
  0xff   :  { %v268_v55 = vpop.f32.mrb[2].mxu1  ;;  %v149_v56 = vpop.f32.mrb[3].mxu0 }
 0x100   :  { %v273_v57 = vmax.f32 %v147_v54, %v268_v55  ;;  %v270_v58 = vpop.f32.mrb[3].mxu1 }
 0x124   :  { %v388_v60 = vpop.f32.mrb[4].mxu0 }
 0x125   :  { %v395_v61 = vmax.f32 %v272_v52, %v388_v60  ;;  %v511_v62 = vpop.f32.mrb[4].mxu1  ;;  %v390_v63 = vpop.f32.mrb[5].mxu0 }
 0x126   :  { %v513_v0 = vpop.f32.mrb[5].mxu1  ;;  %v391_v1 = vpop.f32.mrb[6].mxu0 }
 0x127   :  { %v518_v2 = vmax.f32 %v395_v61, %v511_v62  ;;  %v396_v3 = vmax.f32 %v273_v57, %v391_v1  ;;  %v514_v4 = vpop.f32.mrb[6].mxu1  ;;  %v393_v5 = vpop.f32.mrb[7].mxu0 }
 0x128   :  { %v516_v6 = vpop.f32.mrb[7].mxu1 }
 0x129   :  { %v532_v7 = vadd.f32 %v525_v59, %v518_v2  ;;  %v519_v8 = vmax.f32 %v396_v3, %v514_v4 }
 0x12b   :  { %v533_v10 = vadd.f32 %v530_v9, %v519_v8  ;;  %v534_v11 = vmax.f32 %v532_v7, 0.0 }
 0x12d   :  { %v535_v12 = vmax.f32 %v533_v10, 0.0 }
 0x12f   :  { %v660_v13 = vpack.c.bf16 %v535_v12, %v534_v11 }
 0x131   :  { %661 = vst [vmem:[%s921_s3] sm:$0xff] %v660_v13  }

// kernel: cnn_forward.5
= control target key start
LH: loop header
LB: loop body
LE: loop exit
PB: predicated region body
PF: predicated region fallthrough
CT: control target
= control target key end

     0   :  { %v828_v39 = vmov 0.0   ;;  %vm829_vm0 = vmmov 0   ;;  %s1050_s1 = inlined_call_operand.vmem [shape: bf16[512,128], index: 1, kind: input, shape index: {}]   ;;  %s1051_s0 = inlined_call_operand.vmem [shape: bf16[8,512], index: 0, kind: input, shape index: {}]   ;;  %s1052_s3 = inlined_call_operand.vmem [shape: bf16[128,128], index: 3, kind: input, shape index: {}]   ;;  %s1053_s5 = inlined_call_operand.vmem [shape: bf16[128,128], index: 5, kind: input, shape index: {}]   ;;  %s1054_s2 = inlined_call_operand.vmem [shape: f32[1,128], index: 2, kind: input, shape index: {}]   ;;  %s1055_s4 = inlined_call_operand.vmem [shape: f32[1,128], index: 4, kind: input, shape index: {}]   ;;  %s1056_s6 = inlined_call_operand.vmem [shape: f32[1,128], index: 6, kind: input, shape index: {}]   ;;  %s1057_s7 = inlined_call_operand.vmem [shape: f32[8,128], index: 7, kind: output, shape index: {}]  }
   0x1   :  { %v776_v0 = vld [vmem:[%s1050_s1 + $0x40] sm:$0xff]   ;;  %v780_v4 = vld [vmem:[%s1050_s1 + $0x48] sm:$0xff]   ;;  %v784_v8 = vld [vmem:[%s1050_s1 + $0x50] sm:$0xff]  }
   0x2   :  { %v777_v1 = vld [vmem:[%s1050_s1 + $0xc0] sm:$0xff]   ;;  %672 = vmatprep.subr.bf16.mxu0 %v776_v0  ;;  %v781_v5 = vld [vmem:[%s1050_s1 + $0xc8] sm:$0xff]   ;;  %v785_v9 = vld [vmem:[%s1050_s1 + $0xd0] sm:$0xff]  }
   0x3   :  { %v778_v2 = vld [vmem:[%s1050_s1] sm:$0xff]   ;;  %694 = vmatprep.subr.bf16.mxu1 %v777_v1  ;;  %v782_v6 = vld [vmem:[%s1050_s1 + $0x8] sm:$0xff]   ;;  %v786_v10 = vld [vmem:[%s1050_s1 + $0x10] sm:$0xff]  }
   0x4   :  { %v779_v3 = vld [vmem:[%s1050_s1 + $0x80] sm:$0xff]   ;;  %673 = vmatpush3.bf16.msra.mxu0 %v778_v2  ;;  %v783_v7 = vld [vmem:[%s1050_s1 + $0x88] sm:$0xff]   ;;  %v787_v11 = vld [vmem:[%s1050_s1 + $0x90] sm:$0xff]  }
   0x5   :  { %695 = vmatpush3.bf16.msra.mxu1 %v779_v3  ;;  %674 = vmatprep.subr.bf16.mxu0 %v780_v4  ;;  %v788_v12 = vld [vmem:[%s1050_s1 + $0x58] sm:$0xff]   ;;  %v792_v16 = vld [vmem:[%s1050_s1 + $0x60] sm:$0xff]   ;;  %v796_v20 = vld [vmem:[%s1050_s1 + $0x68] sm:$0xff]  }
   0x6   :  { %696 = vmatprep.subr.bf16.mxu1 %v781_v5  ;;  %v789_v13 = vld [vmem:[%s1050_s1 + $0xd8] sm:$0xff]   ;;  %v793_v17 = vld [vmem:[%s1050_s1 + $0xe0] sm:$0xff]   ;;  %v797_v21 = vld [vmem:[%s1050_s1 + $0xe8] sm:$0xff]  }
   0x7   :  { %v790_v14 = vld [vmem:[%s1050_s1 + $0x18] sm:$0xff]   ;;  %v794_v18 = vld [vmem:[%s1050_s1 + $0x20] sm:$0xff]   ;;  %v798_v22 = vld [vmem:[%s1050_s1 + $0x28] sm:$0xff]  }
   0x8   :  { %675 = vmatpush3.bf16.msra.mxu0 %v782_v6  ;;  %v791_v15 = vld [vmem:[%s1050_s1 + $0x98] sm:$0xff]   ;;  %v795_v19 = vld [vmem:[%s1050_s1 + $0xa0] sm:$0xff]   ;;  %v799_v23 = vld [vmem:[%s1050_s1 + $0xa8] sm:$0xff]  }
   0x9   :  { %697 = vmatpush3.bf16.msra.mxu1 %v783_v7  ;;  %676 = vmatprep.subr.bf16.mxu0 %v784_v8  ;;  %v800_v24 = vld [vmem:[%s1050_s1 + $0x70] sm:$0xff]   ;;  %v804_v28 = vld [vmem:[%s1050_s1 + $0x78] sm:$0xff]   ;;  %v27_v32 = vld [vmem:[%s1051_s0] sm:$0xff] }
   0xa   :  { %698 = vmatprep.subr.bf16.mxu1 %v785_v9  ;;  %v801_v25 = vld [vmem:[%s1050_s1 + $0xf0] sm:$0xff]   ;;  %v805_v29 = vld [vmem:[%s1050_s1 + $0xf8] sm:$0xff]   ;;  %v28_v33 = vld [vmem:[%s1051_s0 + $0x8] sm:$0xff]  ;;  %v618_v34 = vcombine.low %v27_v32, %v27_v32  ;;  %v619_v35 = vcombine.high %v27_v32, %v27_v32 }
   0xb   :  { %v802_v26 = vld [vmem:[%s1050_s1 + $0x30] sm:$0xff]   ;;  %v806_v30 = vld [vmem:[%s1050_s1 + $0x38] sm:$0xff]   ;;  %v620_v36 = vcombine.low %v28_v33, %v28_v33  ;;  %v621_v37 = vcombine.high %v28_v33, %v28_v33  ;;  %v812_v38 = vld [vmem:[%s1052_s3] sm:$0xff]  }
   0xc   :  { %677 = vmatpush3.bf16.msra.mxu0 %v786_v10  ;;  %v803_v27 = vld [vmem:[%s1050_s1 + $0xb0] sm:$0xff]   ;;  %v807_v31 = vld [vmem:[%s1050_s1 + $0xb8] sm:$0xff]   ;;  %338 = vmatprep.mubr.bf16.mxu0 %v619_v35  ;;  %v813_v40 = vld [vmem:[%s1052_s3 + $0x8] sm:$0xff]  }
   0xd   :  { %699 = vmatpush3.bf16.msra.mxu1 %v787_v11  ;;  %678 = vmatprep.subr.bf16.mxu0 %v788_v12  ;;  %v814_v41 = vld [vmem:[%s1052_s3 + $0x10] sm:$0xff]   ;;  %v815_v42 = vld [vmem:[%s1052_s3 + $0x18] sm:$0xff]   ;;  %v816_v43 = vld [vmem:[%s1052_s3 + $0x20] sm:$0xff]  }
   0xe   :  { %700 = vmatprep.subr.bf16.mxu1 %v789_v13  ;;  %378 = vmatprep.mubr.bf16.mxu1 %v621_v37  ;;  %v817_v44 = vld [vmem:[%s1052_s3 + $0x28] sm:$0xff]   ;;  %v818_v45 = vld [vmem:[%s1052_s3 + $0x30] sm:$0xff]   ;;  %v819_v46 = vld [vmem:[%s1052_s3 + $0x38] sm:$0xff]  }
   0xf   :  { %v820_v47 = vld [vmem:[%s1053_s5] sm:$0xff]   ;;  %v821_v48 = vld [vmem:[%s1053_s5 + $0x8] sm:$0xff]   ;;  %v822_v49 = vld [vmem:[%s1053_s5 + $0x10] sm:$0xff]  }
  0x10   :  { %679 = vmatpush3.bf16.msra.mxu0 %v790_v14  ;;  %v823_v50 = vld [vmem:[%s1053_s5 + $0x18] sm:$0xff]   ;;  %v824_v51 = vld [vmem:[%s1053_s5 + $0x20] sm:$0xff]   ;;  %v825_v52 = vld [vmem:[%s1053_s5 + $0x28] sm:$0xff]  }
  0x11   :  { %701 = vmatpush3.bf16.msra.mxu1 %v791_v15  ;;  %680 = vmatprep.subr.bf16.mxu0 %v792_v16  ;;  %v617_v55 = vld [vmem:[%s1054_s2] ss:$0 sm:$0xff]  ;;  %v826_v4 = vld [vmem:[%s1053_s5 + $0x30] sm:$0xff]   ;;  %v827_v5 = vld [vmem:[%s1053_s5 + $0x38] sm:$0xff]  }
  0x12   :  { %702 = vmatprep.subr.bf16.mxu1 %v793_v17  ;;  %v654_v6 = vld [vmem:[%s1055_s4] ss:$0 sm:$0xff] }
  0x13   :  { %v663_v14 = vld [vmem:[%s1056_s6] ss:$0 sm:$0xff] }
  0x14   :  { %681 = vmatpush3.bf16.msra.mxu0 %v794_v18 }
  0x15   :  { %703 = vmatpush3.bf16.msra.mxu1 %v795_v19  ;;  %682 = vmatprep.subr.bf16.mxu0 %v796_v20 }
  0x16   :  { %704 = vmatprep.subr.bf16.mxu1 %v797_v21 }
  0x18   :  { %683 = vmatpush3.bf16.msra.mxu0 %v798_v22 }
  0x19   :  { %705 = vmatpush3.bf16.msra.mxu1 %v799_v23  ;;  %684 = vmatprep.subr.bf16.mxu0 %v800_v24 }
  0x1a   :  { %706 = vmatprep.subr.bf16.mxu1 %v801_v25 }
  0x1c   :  { %685 = vmatpush3.bf16.msra.mxu0 %v802_v26 }
  0x1d   :  { %707 = vmatpush3.bf16.msra.mxu1 %v803_v27  ;;  %686 = vmatprep.subr.bf16.mxu0 %v804_v28 }
  0x1e   :  { %708 = vmatprep.subr.bf16.mxu1 %v805_v29 }
  0x20   :  { %687 = vmatpush3.bf16.msra.mxu0 %v806_v30 }
  0x21   :  { %709 = vmatpush3.bf16.msra.mxu1 %v807_v31  ;;  %734 = vmatprep.subr.bf16.mxu0 %v828_v39 }
  0x22   :  { %754 = vmatprep.subr.bf16.mxu1 %v828_v39 }
  0x23   :  { %339 = vmatmul.mubr.bf16.vlgmr.msra.gmra.mrb[0].mxu0 %v618_v34 }
  0x24   :  { %379 = vmatmul.mubr.bf16.vlgmr.msra.gmra.mrb[0].mxu1 %v620_v36  ;;  %735 = vmatpush3.bf16.msra.mxu0 %v812_v38 }
  0x25   :  { %736 = vmatprep.subr.bf16.mxu0 %v828_v39  ;;  %750 = vmatprep.mubr.msk.bf16.mxu0 %vm829_vm0, %v828_v39 }
  0x26   :  { %770 = vmatprep.mubr.msk.bf16.mxu1 %vm829_vm0, %v828_v39  ;;  %755 = vmatpush3.bf16.msra.mxu1 %v820_v47 }
  0x27   :  { %756 = vmatprep.subr.bf16.mxu1 %v828_v39 }
  0x28   :  { %737 = vmatpush3.bf16.msra.mxu0 %v813_v40 }
  0x29   :  { %738 = vmatprep.subr.bf16.mxu0 %v828_v39 }
  0x2a   :  { %757 = vmatpush3.bf16.msra.mxu1 %v821_v48 }
  0x2b   :  { %758 = vmatprep.subr.bf16.mxu1 %v828_v39 }
  0x2c   :  { %739 = vmatpush3.bf16.msra.mxu0 %v814_v41 }
  0x2d   :  { %740 = vmatprep.subr.bf16.mxu0 %v828_v39 }
  0x2e   :  { %759 = vmatpush3.bf16.msra.mxu1 %v822_v49 }
  0x2f   :  { %760 = vmatprep.subr.bf16.mxu1 %v828_v39 }
  0x30   :  { %741 = vmatpush3.bf16.msra.mxu0 %v815_v42 }
  0x31   :  { %742 = vmatprep.subr.bf16.mxu0 %v828_v39 }
  0x32   :  { %761 = vmatpush3.bf16.msra.mxu1 %v823_v50 }
  0x33   :  { %762 = vmatprep.subr.bf16.mxu1 %v828_v39 }
  0x34   :  { %743 = vmatpush3.bf16.msra.mxu0 %v816_v43 }
  0x35   :  { %744 = vmatprep.subr.bf16.mxu0 %v828_v39 }
  0x36   :  { %763 = vmatpush3.bf16.msra.mxu1 %v824_v51 }
  0x37   :  { %764 = vmatprep.subr.bf16.mxu1 %v828_v39 }
  0x38   :  { %745 = vmatpush3.bf16.msra.mxu0 %v817_v44 }
  0x39   :  { %746 = vmatprep.subr.bf16.mxu0 %v828_v39 }
  0x3a   :  { %765 = vmatpush3.bf16.msra.mxu1 %v825_v52 }
  0x3b   :  { %766 = vmatprep.subr.bf16.mxu1 %v828_v39 }
  0x3c   :  { %747 = vmatpush3.bf16.msra.mxu0 %v818_v45 }
  0x3d   :  { %748 = vmatprep.subr.bf16.mxu0 %v828_v39 }
  0x3e   :  { %767 = vmatpush3.bf16.msra.mxu1 %v826_v4 }
  0x3f   :  { %768 = vmatprep.subr.bf16.mxu1 %v828_v39 }
  0x40   :  { %749 = vmatpush3.bf16.msra.mxu0 %v819_v46 }
  0x42   :  { %769 = vmatpush3.bf16.msra.mxu1 %v827_v5 }
  0xf6   :  { %v688_v53 = vpop.f32.mrb[0].mxu0 }
  0xf7   :  { %v710_v54 = vpop.f32.mrb[0].mxu1  ;;  %v689_v56 = vpop.f32.mrb[1].mxu0 }
  0xf8   :  { %v711_v57 = vpop.f32.mrb[1].mxu1  ;;  %v690_v58 = vadd.f32 %v689_v56, %v688_v53  ;;  %v691_v60 = vpop.f32.mrb[2].mxu0 }
  0xf9   :  { %v712_v59 = vadd.f32 %v711_v57, %v710_v54  ;;  %v713_v61 = vpop.f32.mrb[2].mxu1  ;;  %v692_v62 = vpop.f32.mrb[3].mxu0 }
  0xfa   :  { %v714_v63 = vpop.f32.mrb[3].mxu1  ;;  %v341_v0 = vadd.f32 %v690_v58, %v617_v55 }
  0xfc   :  { %v381_v1 = vadd.f32 %v712_v59, %v341_v0 }
  0xfe   :  { %v386_v2 = vmax.f32 %v381_v1, 0.0 }
 0x100   :  { %v387_v3 = vpack.c.bf16 %v386_v2, %v386_v2 }
 0x102   :  { %751 = vmatmul.mubr.bf16.vlgmr.msra.gmra.mrb[4].mxu0 %v387_v3 }
 0x1d5   :  { %v493_v7 = vpop.f32.mrb[4].mxu0 }
 0x1d6   :  { %v494_v8 = vadd.f32 %v654_v6, %v493_v7  ;;  %v752_v9 = vpop.f32.mrb[5].mxu0 }
 0x1d7   :  { %v496_v10 = vpop.f32.mrb[6].mxu0 }
 0x1d8   :  { %v499_v11 = vmax.f32 %v494_v8, 0.0  ;;  %v753_v12 = vpop.f32.mrb[7].mxu0 }
 0x1da   :  { %v500_v13 = vpack.c.bf16 %v499_v11, %v499_v11 }
 0x1dc   :  { %771 = vmatmul.mubr.bf16.vlgmr.msra.gmra.mrb[4].mxu1 %v500_v13 }
 0x2af   :  { %v606_v15 = vpop.f32.mrb[4].mxu1 }
 0x2b0   :  { %v607_v16 = vadd.f32 %v663_v14, %v606_v15  ;;  %v772_v17 = vpop.f32.mrb[5].mxu1 }
 0x2b1   :  { %v609_v18 = vpop.f32.mrb[6].mxu1 }
 0x2b2   :  { %612 = vst [vmem:[%s1057_s7] sm:$0xff] %v607_v16  ;;  %v773_v19 = vpop.f32.mrb[7].mxu1 }

</bundles_post_ra>
